<compile_context>
chip_gen: v6e
topology: v6e:2x2x1
jax: 0.10.0
libtpu: 0.0.40
codegen_flags: <defaults>
</compile_context>

<pallas_src>
import functools

import jax
import jax.numpy as jnp
import numpy as np
from jax.experimental import pallas as pl
from jax.experimental.pallas import tpu as pltpu


def _channel_attention_kernel(inv_hw, x_ref, w1_ref, w2_ref, o_ref):
    """Bt batch elements per grid step.

    x_ref : (Bt, C, HW)  activations in native NCHW order (HW in lanes)
    w1_ref: (C, Cr)      fc layer 1 weight (= conv1.weight[:, :, 0, 0].T)
    w2_ref: (Cr, C)      fc layer 2 weight (= conv2.weight[:, :, 0, 0].T)
    o_ref : (Bt, 1, C)   sigmoid(fc(avg_pool(x)) + fc(max_pool(x)))
    """
    x = x_ref[...]                                          # (Bt, C, HW)
    bt = x.shape[0]

    # Global average / max pool over HW: cross-lane reduce (XLU slot).
    avg = jnp.sum(x, axis=-1) * inv_hw                      # (Bt, C)
    mx = jnp.max(x, axis=-1)                                # (Bt, C)

    # Both branches share the fc weights -> stack them so each fc layer is a
    # single MXU matmul: (2*Bt, C) @ (C, Cr), then (2*Bt, Cr) @ (Cr, C).
    p = jnp.concatenate([avg, mx], axis=0)                  # (2*Bt, C)
    h = jnp.maximum(
        jnp.dot(p, w1_ref[...], preferred_element_type=jnp.float32), 0.0)
    o = jnp.dot(h, w2_ref[...], preferred_element_type=jnp.float32)

    z = o[:bt, :] + o[bt:, :]                               # avg_out + max_out
    o_ref[...] = jax.nn.sigmoid(z)[:, None, :].astype(o_ref.dtype)


def channel_attention_forward(x_nchw, w1, w2, *, num_steps=None):
    """x_nchw: (B, C, H, W); w1: (C, Cr); w2: (Cr, C). Returns (B, C, 1, 1)."""
    B, C, H, W = x_nchw.shape
    HW = H * W
    Cr = w1.shape[1]

    # Free reshape only -- no transpose; activations are read exactly once.
    x = x_nchw.reshape(B, C, HW)

    if num_steps is None:
        # Two parallel steps cover v7x's two TensorCores; on v5e/v6e the
        # second step costs <1 us of fixed overhead at these sizes.
        num_steps = min(B, 2)
    Bt = -(-B // num_steps)                     # ceil(B / num_steps)
    Bp = num_steps * Bt
    if Bp != B:
        x = jnp.pad(x, ((0, Bp - B), (0, 0), (0, 0)))

    # VMEM sizing: the input block is double-buffered; only raise the scoped
    # limit if the footprint would exceed the smallest default (v5e: 16 MiB).
    block_bytes = Bt * C * HW * x.dtype.itemsize
    vmem_needed = 2 * block_bytes + 4 * (C * Cr * 4) + 2 * Bt * C * 4
    vmem_limit = None
    if vmem_needed > (8 << 20):
        vmem_limit = min(vmem_needed + (4 << 20), 48 << 20)

    kernel = functools.partial(_channel_attention_kernel, 1.0 / HW)
    out = pl.pallas_call(
        kernel,
        out_shape=jax.ShapeDtypeStruct((Bp, 1, C), jnp.float32),
        grid_spec=pltpu.PrefetchScalarGridSpec(
            num_scalar_prefetch=0,
            grid=(num_steps,),
            in_specs=[
                pl.BlockSpec((Bt, C, HW), lambda b: (b, 0, 0)),
                pl.BlockSpec((C, Cr), lambda b: (0, 0)),
                pl.BlockSpec((Cr, C), lambda b: (0, 0)),
            ],
            out_specs=pl.BlockSpec((Bt, 1, C), lambda b: (b, 0, 0)),
        ),
        compiler_params=pltpu.CompilerParams(
            dimension_semantics=("parallel",),
            vmem_limit_bytes=vmem_limit),
    )(x, w1, w2)

    # (Bp, 1, C) -> (B, C, 1, 1), matching the PyTorch module's output shape.
    return out[:B].reshape(B, C, 1, 1)


def channel_attention(x_nchw, conv1_weight, conv2_weight, *, num_steps=None):
    """Takes the raw PyTorch weights: conv1 (Cr, C, 1, 1), conv2 (C, Cr, 1, 1)."""
    w1 = jnp.transpose(conv1_weight[:, :, 0, 0])            # (C, Cr)
    w2 = jnp.transpose(conv2_weight[:, :, 0, 0])            # (Cr, C)
    return channel_attention_forward(x_nchw, w1, w2, num_steps=num_steps)


def channel_attention_reference(x_nchw, conv1_weight, conv2_weight):
    """Pure-JAX reference with identical semantics to the PyTorch module."""
    B, C, _, _ = x_nchw.shape
    w1 = conv1_weight[:, :, 0, 0]                            # (Cr, C)
    w2 = conv2_weight[:, :, 0, 0]                            # (C, Cr)
    avg = jnp.mean(x_nchw, axis=(2, 3))                      # AdaptiveAvgPool2d(1)
    mx = jnp.max(x_nchw, axis=(2, 3))                        # AdaptiveMaxPool2d(1)

    def fc(p):
        return jnp.maximum(p @ w1.T, 0.0) @ w2.T

    out = jax.nn.sigmoid(fc(avg) + fc(mx))
    return out.reshape(B, C, 1, 1)


if __name__ == "__main__":
    key = jax.random.PRNGKey(0)
    k_x, k_w1, k_w2 = jax.random.split(key, 3)

    # ChannelAttention(in_planes=64, ratio=16): hidden = 64 // 16 = 4.
    B, C, H, W = 2, 64, 16, 16
    ratio = 16
    Cr = C // ratio

    x = jax.random.normal(k_x, (B, C, H, W), jnp.float32)
    # Raw PyTorch 1x1-conv weight layouts (out, in, 1, 1), bias-free.
    conv1_w = 0.2 * jax.random.normal(k_w1, (Cr, C, 1, 1), jnp.float32)
    conv2_w = 0.2 * jax.random.normal(k_w2, (C, Cr, 1, 1), jnp.float32)

    out = jax.block_until_ready(channel_attention(x, conv1_w, conv2_w))
    ref = jax.block_until_ready(
        channel_attention_reference(x, conv1_w, conv2_w))

    np.testing.assert_allclose(np.asarray(out), np.asarray(ref),
                               rtol=1e-4, atol=1e-5)
    assert out.shape == (B, C, 1, 1)
    print("KERNEL_OK")
</pallas_src>

<mosaic_0001>
module attributes {stable_mosaic.version = 11 : i64} {
  func.func @_channel_attention_kernel(%arg0: i32, %arg1: memref<1x64x256xf32, #tpu.memory_space<vmem>>, %arg2: memref<64x4xf32, #tpu.memory_space<vmem>>, %arg3: memref<4x64xf32, #tpu.memory_space<vmem>>, %arg4: memref<1x1x64xf32, #tpu.memory_space<vmem>>) attributes {dimension_semantics = [#tpu.dimension_semantics<parallel>], iteration_bounds = array<i64: 2>, scalar_prefetch = 0 : i64, scratch_operands = 0 : i64, tpu.core_type = #tpu.core_type<tc>, window_params = [{transform_indices = @transform_0, window_bounds = array<i64: 1, 64, 256>}, {pipeline_mode = #tpu.pipeline_mode<synchronous>, transform_indices = @transform_1, window_bounds = array<i64: 64, 4>}, {pipeline_mode = #tpu.pipeline_mode<synchronous>, transform_indices = @transform_2, window_bounds = array<i64: 4, 64>}, {transform_indices = @transform_3, window_bounds = array<i64: 1, 1, 64>}]} {
    %c0 = arith.constant 0 : index
    %c0_0 = arith.constant 0 : index
    %c0_1 = arith.constant 0 : index
    %0 = vector.load %arg1[%c0, %c0_0, %c0_1] : memref<1x64x256xf32, #tpu.memory_space<vmem>>, vector<1x64x256xf32>
    %cst = arith.constant dense<0.000000e+00> : vector<1x64xf32>
    %1 = vector.multi_reduction <add>, %0, %cst [2] : vector<1x64x256xf32> to vector<1x64xf32>
    %cst_2 = arith.constant 3.906250e-03 : f32
    %2 = vector.broadcast %cst_2 : f32 to vector<1x64xf32>
    %3 = arith.mulf %1, %2 : vector<1x64xf32>
    %cst_3 = arith.constant dense<0xFF800000> : vector<1x64xf32>
    %4 = vector.multi_reduction <maximumf>, %0, %cst_3 [2] : vector<1x64x256xf32> to vector<1x64xf32>
    %5 = tpu.concatenate %3, %4 in 0 : vector<1x64xf32>, vector<1x64xf32> -> vector<2x64xf32>
    %c0_4 = arith.constant 0 : index
    %c0_5 = arith.constant 0 : index
    %6 = vector.load %arg2[%c0_4, %c0_5] : memref<64x4xf32, #tpu.memory_space<vmem>>, vector<64x4xf32>
    %cst_6 = arith.constant dense<0.000000e+00> : vector<2x4xf32>
    %7 = tpu.matmul %5, %6, %cst_6 {dimension_numbers = #tpu.dot_dimension_numbers<[1], [0], [0], [1], [0, 0, 1, 1], [], []>} : vector<2x64xf32>, vector<64x4xf32>, vector<2x4xf32> -> vector<2x4xf32>
    %cst_7 = arith.constant 0.000000e+00 : f32
    %8 = vector.broadcast %cst_7 : f32 to vector<2x4xf32>
    %9 = arith.maximumf %7, %8 : vector<2x4xf32>
    %c0_8 = arith.constant 0 : index
    %c0_9 = arith.constant 0 : index
    %10 = vector.load %arg3[%c0_8, %c0_9] : memref<4x64xf32, #tpu.memory_space<vmem>>, vector<4x64xf32>
    %cst_10 = arith.constant dense<0.000000e+00> : vector<2x64xf32>
    %11 = tpu.matmul %9, %10, %cst_10 {dimension_numbers = #tpu.dot_dimension_numbers<[1], [0], [0], [1], [0, 0, 1, 1], [], []>} : vector<2x4xf32>, vector<4x64xf32>, vector<2x64xf32> -> vector<2x64xf32>
    %12 = vector.extract_strided_slice %11 {offsets = [0, 0], sizes = [1, 64], strides = [1, 1]} : vector<2x64xf32> to vector<1x64xf32>
    %13 = vector.extract_strided_slice %11 {offsets = [1, 0], sizes = [1, 64], strides = [1, 1]} : vector<2x64xf32> to vector<1x64xf32>
    %14 = arith.addf %12, %13 : vector<1x64xf32>
    %15 = arith.negf %14 : vector<1x64xf32>
    %16 = math.exp %15 : vector<1x64xf32>
    %cst_11 = arith.constant 1.000000e+00 : f32
    %17 = vector.broadcast %cst_11 : f32 to vector<1x64xf32>
    %18 = arith.addf %17, %16 : vector<1x64xf32>
    %19 = arith.divf %17, %18 : vector<1x64xf32>
    %20 = vector.shape_cast %19 : vector<1x64xf32> to vector<1x1x64xf32>
    %c0_12 = arith.constant 0 : index
    %c0_13 = arith.constant 0 : index
    %c0_14 = arith.constant 0 : index
    %21 = vector.load %arg4[%c0_12, %c0_13, %c0_14] : memref<1x1x64xf32, #tpu.memory_space<vmem>>, vector<1x1x64xf32>
    tpu.vector_store %arg4[%c0_12, %c0_13, %c0_14], %20 {strides = array<i32>} : memref<1x1x64xf32, #tpu.memory_space<vmem>>, vector<1x1x64xf32>,
    return
  }
  func.func @transform_0(%arg0: i32) -> (i32, i32, i32) {
    %c0_i32 = arith.constant 0 : i32
    %c0_i32_0 = arith.constant 0 : i32
    %c0_i32_1 = arith.constant 0 : i32
    return %arg0, %c0_i32, %c0_i32_0 : i32, i32, i32
  }
  func.func @transform_1(%arg0: i32) -> (i32, i32) {
    %c0_i32 = arith.constant 0 : i32
    %c0_i32_0 = arith.constant 0 : i32
    %c0_i32_1 = arith.constant 0 : i32
    return %c0_i32, %c0_i32_0 : i32, i32
  }
  func.func @transform_2(%arg0: i32) -> (i32, i32) {
    %c0_i32 = arith.constant 0 : i32
    %c0_i32_0 = arith.constant 0 : i32
    %c0_i32_1 = arith.constant 0 : i32
    return %c0_i32, %c0_i32_0 : i32, i32
  }
  func.func @transform_3(%arg0: i32) -> (i32, i32, i32) {
    %c0_i32 = arith.constant 0 : i32
    %c0_i32_0 = arith.constant 0 : i32
    %c0_i32_1 = arith.constant 0 : i32
    return %arg0, %c0_i32, %c0_i32_0 : i32, i32, i32
  }
}

</mosaic_0001>

<bundles_post_ra>
// kernel: tpu_custom_call.1
= control target key start
LH: loop header
LB: loop body
LE: loop exit
PB: predicated region body
PF: predicated region fallthrough
CT: control target
= control target key end

     0   :  { %8 = vsyncpa [#allocation3], 0  ;;  %s1052_s0 = inlined_call_operand.hbm [shape: f32[2,64,256], index: 0, kind: input, shape index: {}]   ;;  %s1053_s1 = inlined_call_operand.vmem [shape: f32[64,4], index: 1, kind: input, shape index: {}]   ;;  %s1054_s2 = inlined_call_operand.vmem [shape: f32[4,64], index: 2, kind: input, shape index: {}]   ;;  %s1055_s3 = inlined_call_operand.hbm [shape: f32[2,1,64], index: 3, kind: output, shape index: {}]  }
   0x1   :  { %10 = vsyncpa [#allocation3 + $0x1], 0 }
   0x2   :  { %11 = vsyncpa [#allocation4], 0 }
   0x3   :  { %13 = vsyncpa [#allocation4 + $0x1], 0  ;;  %s852_s12 = smov 0   ;;  %s854_s13 = smov 0  }
   0x4   :  { %s856_s14 = smov 0   ;;  %s858_s15 = smov 0  }
   0x5 LB: > { %s873_s16 = sadd.s32 4294967295, %s824_s15   ;;  %s627_s17 = sadd.s32 4294967294, %s824_s15   ;;  %s824_s15 = sphi %s858_s15, %s1070_s15   ;;  %s820_s14 = sphi %s856_s14, %s1069_s14   ;;  %s816_s13 = sphi %s854_s13, %s1068_s13   ;;  %s812_s12 = sphi %s852_s12, %s1067_s12  }
   0x6   : > { %s877_s18 = sadd.s32 1, %s824_s15   ;;  %s26_s19 = sadd.s32 1, %s820_s14 }
   0x7   : > { %s23_s20 = ssub.s32 %s824_s15, %s877_s18  ;;  %p33_p0 = scmp.ne.s32.totalorder %s820_s14, %s816_s13 }
   0x8   : > { %p24_p1 = scmp.eq.s32.totalorder %s23_s20, 0  ;;  %p34_p2 = scmp.eq.s32.totalorder %s824_s15, 0 }
   0x9   : > { %p39_p3 = scmp.ne.s32.totalorder %s816_s13, %s812_s12  ;;  %p40_p4 = scmp.eq.s32.totalorder %s873_s16, 0 }
   0xa   : > { %s889_s21 = scalar_select %p24_p1, %s820_s14, %s26_s19  }
   0xb   : > { %p891_p5 = por %p34_p2, %p33_p0  ;;  %p895_p6 = por %p40_p4, %p39_p3 }
   0xc   : > { %p105_p7 = scmp.eq.s32.totalorder %s873_s16, 1  ;;  %p111_p8 = scmp.eq.s32.totalorder %s627_s17, 1 }
   0xd   : > { %s1059_s23 = scalar_select %p895_p6, 1, 0 }
   0xe   : > { %p690_p10 = scmp.lt.s32.totalorder %s824_s15, 2  ;;  %p902_p11 = por %p105_p7, %p33_p0 }
   0xf   : > { %p906_p12 = por %p111_p8, %p39_p3  ;;  %s137_s26 = sand.u32 1, %s820_s14  }
  0x10   : > { %s1060_s24 = scalar_select %p902_p11, 1, 0 }
  0x11   : > { %s1061_s25 = scalar_select %p906_p12, 1, 0 }
  0x12   : > { %s642_s27 = sshll.u32 %s824_s15, 11  ;;  %s630_s28 = sshll.u32 %s137_s26, 7 }
  0x13   : > { %s915_s4 = scalar_lea.hbm %s1052_s0, %s642_s27  ;;  %s141_s5 = scalar_lea.vmem [#allocation2], %s630_s28 }
  0x14   : > { %s148_s6 = sshll.u32 %s141_s5, 4  ;;  %p919_p13 = pnand %p690_p10, %p891_p5  ;;  %s923_s6 = int_to_ptr.vmem [resolvable:$true] %s148_s6 }
  0x15   : > { %s925_s8 = scalar_lea.sflag [#allocation3], %s137_s26  ;;  %s732_s9 = scalar_lea.hbm %s915_s4, 2048 }
  0x16   : > { %p733_p0 = scmp.ne.s32.totalorder %s915_s4, %s732_s9  ;;  %p734_p1 = pneg %p919_p13 }
  0x17   : > { %s737_s17 = scalar_lea.hbm %s1052_s0, 4096  ;;  %p738_p4 = scmp.lt.s32.totalorder %s915_s4, %s1052_s0 }
  0x18   : > { %p735_p2 = pnand %p734_p1, %p733_p0  ;;  %p739_p5 = scmp.lt.s32.totalorder %s737_s17, %s732_s9 }
  0x1a   : > { %p736_p3 = pneg %p735_p2  ;;  %p740_p7 = por %p739_p5, %p738_p4 }
  0x1c   : > { %p741_p8 = pnand %p740_p7, %p736_p3 }
  0x1e   : > { %744 = shalt.err (!%p741_p8)
}
  0x1f   : > { %s745_s22 = scalar_lea.vmem %s923_s6, 2048  ;;  %s826_s26 = smov [#allocation2]  }
  0x20   : > { %p746_p10 = scmp.ne.s32.totalorder %s923_s6, %s745_s22  ;;  %s750_s27 = sshll.u32 %s826_s26, 4  ;;  %s751_s27 = int_to_ptr.vmem [resolvable:$false] %s750_s27 }
  0x21   : > { %s752_s28 = scalar_lea.vmem %s751_s27, 4096  ;;  %p753_p2 = scmp.lt.s32.totalorder %s923_s6, %s751_s27 }
  0x22   : > { %p748_p9 = pnand %p746_p10, %p734_p1  ;;  %p754_p12 = scmp.lt.s32.totalorder %s752_s28, %s745_s22 }
  0x24   : > { %p749_p0 = pneg %p748_p9  ;;  %p755_p11 = por %p754_p12, %p753_p2 }
  0x26   : > { %p756_p6 = pnand %p755_p11, %p749_p0 }
  0x28   : > { %759 = shalt.err (!%p756_p6)
}
  0x29   : > { %s827_s29 = smov 256   ;;  %s828_s30 = smov 16  }
  0x2a   : > { %685 = dma.hbm_to_vmem [thread:$0]  (!%p919_p13), %s915_s4, 2048, %s923_s6, %s925_s8, %s827_s29, %s827_s29, %s828_s30  }
  0x2b   : > { %p633_p9 = scmp.ge.s32.totalorder %s824_s15, 1  ;;  %p156_p1 = scmp.lt.s32.totalorder %s824_s15, 3 }
  0x2d   : > { %p157_p3 = pnand %p633_p9, %p156_p1 }
  0x2e   : > { %s949_s5 = sand.u32 (!%p157_p3), 1, %s816_s13   ;;  %p1063_p6 = scmp.ne.s32.totalorder (!%p157_p3), %s1059_s23, 0 }
  0x2f   : > { %160 = sbr.rel (%p157_p3) target bundleno = 665 (0x299), region = 32  ;;  %s634_s9 = sshll.u32 (!%p157_p3), %s949_s5, 7 }
  0x30   : > { %s163_s10 = scalar_lea.sflag (!%p157_p3), [#allocation3], %s949_s5  ;;  %s953_s11 = scalar_lea.vmem (!%p157_p3), [#allocation2], %s634_s9 }
  0x34   : > { %803 = dma.done.wait (%p1063_p6), %s163_s10, 2048  }
  0x35   : > { %805 = vsyncadd (%p1063_p6), %s163_s10, 4294965248  ;;  %v192_v0 = vld [vmem:[%s953_s11 + $0x20] sm:$0xff]  ;;  %v193_v1 = vld [vmem:[%s953_s11 + $0x28] sm:$0xff]  ;;  %v829_v32 = vmov 0.0   ;;  %vm830_vm0 = vmmov 0   ;;  %v268_v44 = vlaneseq  ;;  %vm279_vm1 = vcmask 130112  }
  0x36   : > { %v188_v2 = vld [vmem:[%s953_s11] sm:$0xff]  ;;  %v210_v3 = vadd.f32 %v193_v1, %v192_v0  ;;  %v189_v4 = vld [vmem:[%s953_s11 + $0x8] sm:$0xff]  ;;  %v194_v5 = vld [vmem:[%s953_s11 + $0x30] sm:$0xff]  ;;  %v242_v16 = vmax.f32 %v192_v0, %v193_v1  ;;  %654 = vmatprep.subr.mxu0 %v829_v32  ;;  %673 = vmatprep.subr.mxu1 %v829_v32  ;;  %vm286_vm2 = vcmask 195712   ;;  %vm293_vm3 = vcmask 261312   ;;  %s639_s4 = sshll.u32 %s873_s16, 4 }
  0x37   : > { %v195_v6 = vld [vmem:[%s953_s11 + $0x38] sm:$0xff]  ;;  %v204_v7 = vadd.f32 %v189_v4, %v188_v2  ;;  %v190_v8 = vld [vmem:[%s953_s11 + $0x10] sm:$0xff]  ;;  %v236_v13 = vmax.f32 %v188_v2, %v189_v4  ;;  %v196_v14 = vld [vmem:[%s953_s11 + $0x40] sm:$0xff]  ;;  %670 = vmatprep.mubr.msk.f32.mxu0 %vm830_vm0, %v829_v32  ;;  %675 = vmatprep.mubr.msk.f32.mxu1 %vm830_vm0, %v829_v32  ;;  %v269_v47 = vand.u32 127, %v268_v44  ;;  %v271_v51 = vshrl.u32 %v268_v44, 7  ;;  %s187_s6 = scalar_lea.vmem [#allocation5], %s949_s5  ;;  %s1015_s19 = scalar_lea.hbm %s1055_s3, %s639_s4 }
  0x38   : > { %v191_v9 = vld [vmem:[%s953_s11 + $0x18] sm:$0xff]  ;;  %211 = vadd.xlane.f32.xlu1 %v210_v3  ;;  %v213_v10 = vadd.f32 %v195_v6, %v194_v5  ;;  %v197_v15 = vld [vmem:[%s953_s11 + $0x48] sm:$0xff]  ;;  %v198_v18 = vld [vmem:[%s953_s11 + $0x50] sm:$0xff]  ;;  %v245_v20 = vmax.f32 %v194_v5, %v195_v6  ;;  %vm300_vm4 = vcmask 326912   ;;  %vm307_vm5 = vcmask 392512   ;;  %s561_s7 = sshll.u32 %s187_s6, 4  ;;  %s562_s7 = int_to_ptr.vmem [resolvable:$true] %s561_s7 }
  0x39   : > { %205 = vadd.xlane.f32.xlu0 %v204_v7  ;;  %v207_v11 = vadd.f32 %v191_v9, %v190_v8  ;;  %v239_v12 = vmax.f32 %v190_v8, %v191_v9  ;;  %v216_v17 = vadd.f32 %v197_v15, %v196_v14  ;;  %v199_v19 = vld [vmem:[%s953_s11 + $0x58] sm:$0xff]  ;;  %v200_v22 = vld [vmem:[%s953_s11 + $0x60] sm:$0xff]  ;;  %v201_v23 = vld [vmem:[%s953_s11 + $0x68] sm:$0xff]  ;;  %v248_v24 = vmax.f32 %v196_v14, %v197_v15  ;;  %s549_s20 = scalar_lea.sflag [#allocation4], %s949_s5  ;;  %s760_s22 = scalar_lea.vmem %s562_s7, 16 }
  0x3a   : > { %v219_v21 = vadd.f32 %v199_v19, %v198_v18  ;;  %v222_v25 = vadd.f32 %v201_v23, %v200_v22  ;;  %v202_v26 = vld [vmem:[%s953_s11 + $0x70] sm:$0xff]  ;;  %v203_v27 = vld [vmem:[%s953_s11 + $0x78] sm:$0xff]  ;;  %v251_v28 = vmax.f32 %v198_v18, %v199_v19  ;;  %v254_v31 = vmax.f32 %v200_v22, %v201_v23  ;;  %v379_v35 = vld [vmem:[%s1053_s1 + $0x28] sm:$0xff]  ;;  %p761_p11 = scmp.ne.s32.totalorder %s562_s7, %s760_s22  ;;  %p1064_p12 = scmp.ne.s32.totalorder %s1060_s24, 0 }
  0x3b   : > { %v225_v29 = vadd.f32 %v203_v27, %v202_v26  ;;  %v257_v30 = vmax.f32 %v202_v26, %v203_v27  ;;  %v381_v33 = vld [vmem:[%s1053_s1 + $0x38] sm:$0xff]  ;;  %v380_v34 = vld [vmem:[%s1053_s1 + $0x30] sm:$0xff]  ;;  %v378_v36 = vld [vmem:[%s1053_s1 + $0x20] sm:$0xff]  ;;  %v274_v49 = vadd.s32 4294967288, %v269_v47  ;;  %v281_v55 = vadd.s32 4294967280, %v269_v47  ;;  %s831_s26 = smov [#allocation5]  }
  0x3c   : > { %214 = vadd.xlane.f32.xlu1 %v213_v10  ;;  %655 = vmatpush3.msra.mxu0 %v381_v33  ;;  %v377_v37 = vld [vmem:[%s1053_s1 + $0x18] sm:$0xff]  ;;  %v376_v38 = vld [vmem:[%s1053_s1 + $0x10] sm:$0xff]  ;;  %v375_v39 = vld [vmem:[%s1053_s1 + $0x8] sm:$0xff]  ;;  %v272_v57 = vsub.s32 %v269_v47, %v271_v51  ;;  %v288_v59 = vadd.s32 4294967272, %v269_v47  ;;  %v295_v61 = vadd.s32 4294967264, %v269_v47  ;;  %v302_v62 = vadd.s32 4294967256, %v269_v47  ;;  %p762_p13 = pnand %p761_p11, %p1064_p12 }
  0x3d   : > { %208 = vadd.xlane.f32.xlu0 %v207_v11  ;;  %656 = vmatprep.subr.mxu0 %v829_v32  ;;  %v374_v40 = vld [vmem:[%s1053_s1] sm:$0xff]  ;;  %v277_v53 = vsub.s32 %v274_v49, %v271_v51  ;;  %v284_v0 = vsub.s32 %v281_v55, %v271_v51  ;;  %v309_v3 = vadd.s32 4294967248, %v269_v47  ;;  %v316_v8 = vadd.s32 4294967240, %v269_v47  ;;  %s764_s27 = sshll.u32 %s831_s26, 4  ;;  %s765_s27 = int_to_ptr.vmem [resolvable:$false] %s764_s27 }
  0x3e   : > { %657 = vmatpush3.msra.mxu0 %v380_v34  ;;  %v291_v5 = vsub.s32 %v288_v59, %v271_v51  ;;  %v298_v9 = vsub.s32 %v295_v61, %v271_v51  ;;  %v305_v11 = vsub.s32 %v302_v62, %v271_v51  ;;  %vm314_vm6 = vcmask 458112   ;;  %p763_p4 = pneg %p762_p13  ;;  %s766_s16 = scalar_lea.vmem %s765_s27, 32 }
  0x3f   : > { %658 = vmatprep.subr.mxu0 %v829_v32  ;;  %v312_v18 = vsub.s32 %v309_v3, %v271_v51  ;;  %v319_v23 = vsub.s32 %v316_v8, %v271_v51  ;;  %vm321_vm7 = vcmask 523712   ;;  %vm372_vm8 = vcmask 1040384   ;;  %p767_p5 = scmp.lt.s32.totalorder %s562_s7, %s765_s27  ;;  %p768_p7 = scmp.lt.s32.totalorder %s766_s16, %s760_s22 }
  0x40   : > { %240 = vmax.xlane.f32.xlu1 %v239_v12  ;;  %659 = vmatpush3.msra.mxu0 %v379_v35  ;;  %vm382_vm9 = vcmask 523264   ;;  %vm462_vm10 = vcmask 1043456   ;;  %vm458_vm11 = vcmask 31744   ;;  %vm546_vm12 = vcmask 516096  }
  0x41   : > { %237 = vmax.xlane.f32.xlu0 %v236_v13  ;;  %660 = vmatprep.subr.mxu0 %v829_v32  ;;  %p769_p8 = por %p768_p7, %p767_p5 }
  0x42   : > { %661 = vmatpush3.msra.mxu0 %v378_v36 }
  0x43   : > { %662 = vmatprep.subr.mxu0 %v829_v32  ;;  %p770_p10 = pnand %p769_p8, %p763_p4 }
  0x44   : > { %243 = vmax.xlane.f32.xlu1 %v242_v16  ;;  %663 = vmatpush3.msra.mxu0 %v377_v37 }
  0x45   : > { %217 = vadd.xlane.f32.xlu0 %v216_v17  ;;  %664 = vmatprep.subr.mxu0 %v829_v32 }
  0x46   : > { %665 = vmatpush3.msra.mxu0 %v376_v38 }
  0x47   : > { %666 = vmatprep.subr.mxu0 %v829_v32 }
  0x48   : > { %246 = vmax.xlane.f32.xlu1 %v245_v20  ;;  %667 = vmatpush3.msra.mxu0 %v375_v39 }
  0x49   : > { %220 = vadd.xlane.f32.xlu0 %v219_v21  ;;  %668 = vmatprep.subr.mxu0 %v829_v32 }
  0x4a   : > { %669 = vmatpush3.msra.mxu0 %v374_v40 }
  0x4c   : > { %249 = vmax.xlane.f32.xlu1 %v248_v24 }
  0x4d   : > { %223 = vadd.xlane.f32.xlu0 %v222_v25 }
  0x50   : > { %252 = vmax.xlane.f32.xlu1 %v251_v28 }
  0x51   : > { %226 = vadd.xlane.f32.xlu0 %v225_v29 }
  0x54   : > { %258 = vmax.xlane.f32.xlu1 %v257_v30 }
  0x55   : > { %255 = vmax.xlane.f32.xlu0 %v254_v31 }
  0xc1   : > { %v212_v41 = vpop.xlane.xlu1 %211 }
  0xc2   : > { %v206_v42 = vpop.xlane.xlu0 %205  ;;  %v230_v1 = vmul.f32 0.00390625, %v212_v41 }
  0xc3   : > { %v228_v58 = vmul.f32 0.00390625, %v206_v42 }
  0xc4   : > { %v285_v16 = vrot.slane %v230_v1, %v284_v0 }
  0xc5   : > { %v215_v43 = vpop.xlane.xlu1 %214  ;;  %v273_v4 = vrot.slane %v228_v58, %v272_v57 }
  0xc6   : > { %v209_v45 = vpop.xlane.xlu0 %208  ;;  %v231_v6 = vmul.f32 0.00390625, %v215_v43 }
  0xc7   : > { %v229_v54 = vmul.f32 0.00390625, %v209_v45 }
  0xc8   : > { %v292_v21 = vrot.slane %v231_v6, %v291_v5 }
  0xc9   : > { %v241_v46 = vpop.xlane.xlu1 %240  ;;  %v278_v63 = vrot.slane %v229_v54, %v277_v53 }
  0xca   : > { %v238_v48 = vpop.xlane.xlu0 %237  ;;  %v339_v13 = vrot.slane %v241_v46, %v277_v53 }
  0xcb   : > { %v280_v12 = vsel %vm279_vm1, %v278_v63, %v273_v4  ;;  %v335_v14 = vrot.slane %v238_v48, %v272_v57 }
  0xcc   : > { %v287_v25 = vsel %vm286_vm2, %v285_v16, %v280_v12 }
  0xcd   : > { %v244_v50 = vpop.xlane.xlu1 %243  ;;  %v340_v29 = vsel %vm279_vm1, %v339_v13, %v335_v14  ;;  %v294_v35 = vsel %vm293_vm3, %v292_v21, %v287_v25 }
  0xce   : > { %v218_v52 = vpop.xlane.xlu0 %217  ;;  %v344_v17 = vrot.slane %v244_v50, %v284_v0  ;;  %v457_v50 = vld [vmem:[%s1054_s2] sm:$0xf] }
  0xcf   : > { %v232_v10 = vmul.f32 0.00390625, %v218_v52  ;;  %674 = vmatpush3.msk.msra.mxu1 %vm462_vm10, %v457_v50 }
  0xd0   : > { %v345_v32 = vsel %vm286_vm2, %v344_v17, %v340_v29 }
  0xd1   : > { %v247_v56 = vpop.xlane.xlu1 %246  ;;  %v299_v26 = vrot.slane %v232_v10, %v298_v9 }
  0xd2   : > { %v221_v60 = vpop.xlane.xlu0 %220  ;;  %v349_v22 = vrot.slane %v247_v56, %v291_v5 }
  0xd3   : > { %v233_v15 = vmul.f32 0.00390625, %v221_v60  ;;  %v301_v40 = vsel %vm300_vm4, %v299_v26, %v294_v35 }
  0xd4   : > { %v350_v36 = vsel %vm293_vm3, %v349_v22, %v345_v32 }
  0xd5   : > { %v250_v2 = vpop.xlane.xlu1 %249  ;;  %v306_v30 = vrot.slane %v233_v15, %v305_v11 }
  0xd6   : > { %v224_v7 = vpop.xlane.xlu0 %223  ;;  %v354_v27 = vrot.slane %v250_v2, %v298_v9 }
  0xd7   : > { %v234_v19 = vmul.f32 0.00390625, %v224_v7  ;;  %v308_v43 = vsel %vm307_vm5, %v306_v30, %v301_v40 }
  0xd8   : > { %v355_v41 = vsel %vm300_vm4, %v354_v27, %v350_v36 }
  0xd9   : > { %v253_v20 = vpop.xlane.xlu1 %252  ;;  %v313_v33 = vrot.slane %v234_v19, %v312_v18 }
  0xda   : > { %v227_v24 = vpop.xlane.xlu0 %226  ;;  %v359_v31 = vrot.slane %v253_v20, %v305_v11 }
  0xdb   : > { %v235_v28 = vmul.f32 0.00390625, %v227_v24  ;;  %v315_v45 = vsel %vm314_vm6, %v313_v33, %v308_v43 }
  0xdc   : > { %v360_v44 = vsel %vm307_vm5, %v359_v31, %v355_v41 }
  0xdd   : > { %v259_v34 = vpop.xlane.xlu1 %258  ;;  %v320_v37 = vrot.slane %v235_v28, %v319_v23 }
  0xde   : > { %v256_v38 = vpop.xlane.xlu0 %255  ;;  %v369_v39 = vrot.slane %v259_v34, %v319_v23 }
  0xdf   : > { %v364_v42 = vrot.slane %v256_v38, %v312_v18  ;;  %v322_v48 = vsel %vm321_vm7, %v320_v37, %v315_v45 }
  0xe1   : > { %v365_v46 = vsel %vm314_vm6, %v364_v42, %v360_v44 }
  0xe2   : > { %v370_v47 = vsel %vm321_vm7, %v369_v39, %v365_v46 }
  0xe3   : > { %v373_v49 = vsel %vm372_vm8, %v322_v48, %v370_v47 }
  0xe4   : > { %671 = vmatmul.mubr.msk.f32.vlgmr.msra.gmra.mxu0 %vm382_vm9, %v373_v49 }
 0x1a4   : > { %v452_v51 = vpop.f32.mrf.mxu0 }
 0x1a5   : > { %v456_v52 = vmax.f32 %v452_v51, 0.0 }
 0x1a6   : > { %v672_v53 = vpop.f32.mrf.mxu0 }
 0x1a7   : > { %676 = vmatmul.mubr.msk.f32.vlgmr.msra.gmra.mxu1 %vm458_vm11, %v456_v52 }
 0x267   : > { %v532_v54 = vpop.f32.mrf.mxu1 }
 0x268   : > { %v537_v55 = vrot.slane %v532_v54, 1 }
 0x269   : > { %v677_v56 = vpop.f32.mrf.mxu1 }
 0x26a   : > { %v539_v57 = vadd.f32 %v537_v55, %v532_v54 }
 0x26c   : > { %v638_v58 = vmul.f32 -1.442695, %v539_v57 }
 0x26e   : > { %728 = vpow2.f32 %v638_v58 }
 0x27b   : > { %v729_v59 = vpop.eup %728 }
 0x27c   : > { %v543_v60 = vadd.f32 1.0, %v729_v59 }
 0x27e   : > { %730 = vrcp.f32 %v543_v60 }
 0x28b   : > { %v731_v61 = vpop.eup %730 }
 0x28c   : > { %547 = vst.msk [vmem:[%s187_s6] sm:$0x1] %vm546_vm12, %v731_v61 }
 0x28d   : > { %773 = shalt.err (!%p770_p10)
}
 0x28e   : > { %s774_s28 = scalar_lea.hbm %s1015_s19, 16  ;;  %s778_s30 = scalar_lea.hbm %s1055_s3, 32 }
 0x28f   : > { %p775_p0 = scmp.ne.s32.totalorder %s1015_s19, %s774_s28  ;;  %p779_p1 = scmp.lt.s32.totalorder %s1015_s19, %s1055_s3 }
 0x290   : > { %p780_p3 = scmp.lt.s32.totalorder %s778_s30, %s774_s28 }
 0x291   : > { %p776_p2 = pnand %p775_p0, %p1064_p12 }
 0x292   : > { %p781_p6 = por %p780_p3, %p779_p1 }
 0x293   : > { %p777_p9 = pneg %p776_p2 }
 0x295   : > { %p782_p11 = pnand %p781_p6, %p777_p9 }
 0x297   : > { %785 = shalt.err (!%p782_p11)
}
 0x298   : > { %680 = dma.vmem_to_hbm [thread:$0]  (%p1064_p12), %s562_s7, 16, %s1015_s19, %s549_s20  }
 0x299 PF: > { %s573_s11 = sand.u32 1, %s812_s12   ;;  %p1065_p13 = scmp.ne.s32.totalorder %s1061_s25, 0 }
 0x29a   : > { %p1066_p4 = scmp.ge.s32.totalorder %s824_s15, 2  ;;  %s574_s23 = scalar_lea.sflag [#allocation4], %s573_s11 }
 0x29c   : > { %p687_p5 = pnand %p1066_p4, %p1065_p13 }
 0x29e   : > { %p688_p7 = pneg %p687_p5 }
 0x2a0   : > { %807 = dma.done.wait (%p688_p7), %s574_s23, 16  }
 0x2a1   : > { %809 = vsyncadd (%p688_p7), %s574_s23, 4294967280  ;;  %p16_p8 = scmp.ge.s32.totalorder %s877_s18, 4   ;;  %s1067_s12 = smov %s816_s13 }
 0x2a2   : > { %s1068_s13 = smov %s820_s14  ;;  %s1069_s14 = smov %s889_s21 }
 0x2a3   : > { %s1070_s15 = smov %s877_s18  ;;  %18 = sbr.rel (!%p16_p8) target bundleno = 5 (0x5), region = 77 }
 0x2a8   :  { %578 = vsyncpa [#allocation3], 1 }
 0x2a9   :  { %580 = vsyncpa [#allocation3 + $0x1], 1 }
 0x2aa   :  { %581 = vsyncpa [#allocation4], 1 }
 0x2ab   :  { %583 = vsyncpa [#allocation4 + $0x1], 1 }

</bundles_post_ra>
